<compile_context>
chip_gen: v6e
topology: v6e:2x2x1
jax: 0.10.0
libtpu: 0.0.40
codegen_flags: <defaults>
</compile_context>

<pallas_src>
import jax
import jax.numpy as jnp
from jax import lax
from jax.experimental import pallas as pl
from jax.experimental.pallas import tpu as pltpu

_LANES = 128
_SUBLANES = 8


def _round_up(n, m):
    return ((n + m - 1) // m) * m


def _pad_axis(a, axis, new_size):
    pad = new_size - a.shape[axis]
    if pad <= 0:
        return a
    widths = [(0, 0)] * a.ndim
    widths[axis] = (0, pad)
    return jnp.pad(a, widths)


# ---------------------------------------------------------------------------
# One-time parameter preparation (model-load time, NOT per forward).
# ---------------------------------------------------------------------------
def prepare_params(params, *, weights_dtype=jnp.float32):
    """Fold mask, transpose to (in, out), pad hidden widths to 128 lanes.

    * mask is binary, so a single fold reproduces the module's init-mask +
      forward-mask behavior exactly.
    * Padded weight rows/cols and bias cols are zero, so ReLU(0)=0 propagates
      and the math is unchanged.
    * weights_dtype=jnp.bfloat16 halves VMEM residency / HBM fill (recommended
      on v7x's 64 MiB VMEM, throughput win on v6e).  Matmuls still accumulate
      in f32; bias-add / ReLU stay f32 (v5e has no bf16 VPU path).
    * The final (->1) layer is kept in (out=1, in) layout so the kernel can
      produce a lane-dense (1, block_b) output row directly.

    Returns a list of (weight, bias) pairs consumed by cds_mlp_forward.
    """
    wg = params["wg"] * params["mask"]  # (n_gene, n_in)
    ws = [wg, params["w1"], params["w2"], params["w3"], params["w4"], params["w5"]]
    bs = [params["bg"], params["b1"], params["b2"], params["b3"], params["b4"],
          params["b5"]]

    n_layers = len(ws)
    prepared = []
    for li, (w, b) in enumerate(zip(ws, bs)):
        out_f, in_f = w.shape
        in_pad = in_f if li == 0 else _round_up(in_f, _LANES)   # n_in stays as-is
        last = li == n_layers - 1
        out_pad = out_f if last else _round_up(out_f, _LANES)
        w = _pad_axis(_pad_axis(w, 0, out_pad), 1, in_pad)
        b = _pad_axis(jnp.reshape(b, (1, -1)), 1, out_pad)
        if last:
            # keep (1, in_pad): final layer contracts on the rhs last dim.
            w_prep = jnp.asarray(w, dtype=weights_dtype)
        else:
            w_prep = jnp.asarray(w.T, dtype=weights_dtype)      # (in_pad, out_pad)
        prepared.append((w_prep, jnp.asarray(b, dtype=jnp.float32)))
    return prepared


# ---------------------------------------------------------------------------
# Kernel
# ---------------------------------------------------------------------------
def _cds_mlp_kernel(x_ref,
                    wg_ref, bg_ref,
                    w1_ref, b1_ref,
                    w2_ref, b2_ref,
                    w3_ref, b3_ref,
                    w4_ref, b4_ref,
                    w5_ref, b5_ref,
                    o_ref):
    def dense_relu(h, w_ref, b_ref):
        # Weights may be bf16; accumulate in f32, bias-add / ReLU in f32.
        y = jnp.dot(h.astype(w_ref.dtype), w_ref[...],
                    preferred_element_type=jnp.float32) + b_ref[...]
        return jnp.maximum(y, 0.0)

    h = x_ref[...].astype(jnp.float32)
    h = dense_relu(h, wg_ref, bg_ref)
    h = dense_relu(h, w1_ref, b1_ref)
    h = dense_relu(h, w2_ref, b2_ref)
    h = dense_relu(h, w3_ref, b3_ref)
    h = dense_relu(h, w4_ref, b4_ref)

    # Final layer emitted directly as a lane-dense (1, block_b) row:
    # w5 (1, K) contracted with h (block_b, K) over K  ->  (1, block_b).
    row = lax.dot_general(
        w5_ref[...], h.astype(w5_ref.dtype),
        dimension_numbers=(((1,), (1,)), ((), ())),
        preferred_element_type=jnp.float32) + b5_ref[...]
    o_ref[...] = row.astype(o_ref.dtype)


# ---------------------------------------------------------------------------
# Forward wrapper
# ---------------------------------------------------------------------------
def cds_mlp_forward(x, prepared, *, block_b=None,
                    vmem_budget_bytes=48 * 1024 * 1024):
    """Forward pass.  `prepared` is the output of prepare_params()."""
    B, n_in = x.shape
    assert prepared[0][0].shape[0] == n_in, "x feature dim mismatch"

    flat = [a for wb in prepared for a in wb]
    weight_bytes = sum(int(a.size) * a.dtype.itemsize for a in flat)
    max_h = max(int(w.shape[1]) for w, _ in prepared[:-1])   # widest hidden width

    # ---- batch-tile selection (VMEM-derived) ------------------------------
    # Per batch row: 2x double-buffered x tile + 2x out tile + ~3 live f32
    # activation rows of the widest hidden layer.
    per_row_bytes = 2 * n_in * x.dtype.itemsize + 2 * 4 + 3 * max_h * 4
    avail = max(vmem_budget_bytes - int(1.25 * weight_bytes),
                per_row_bytes * _SUBLANES)
    vmem_cap = max(_SUBLANES,
                   min(2048, (avail // per_row_bytes) // _SUBLANES * _SUBLANES))
    if block_b is None:
        # Aim for >=2 grid steps when the batch allows it so the "parallel"
        # batch axis shards across both TensorCores on v7x.
        if B > _SUBLANES:
            target = _round_up(-(-B // 2), _SUBLANES)
        else:
            target = _round_up(B, _SUBLANES)
        block_b = min(vmem_cap, target)
    block_b = max(_SUBLANES, _round_up(block_b, _SUBLANES))

    num_tiles = pl.cdiv(B, block_b)

    # Advisory cost estimate (lets XLA overlap the producer of x).
    layer_dims = [(int(w.shape[0]), int(w.shape[1])) for w, _ in prepared]
    flops = 2 * B * sum(a * b for a, b in layer_dims)
    bytes_accessed = (B * n_in * x.dtype.itemsize + weight_bytes
                      + num_tiles * block_b * 4)

    # Scoped-VMEM limit: resident weights + pipelined tiles + headroom.
    vmem_limit = int(1.5 * weight_bytes) + per_row_bytes * block_b + (4 << 20)
    vmem_limit = min(max(vmem_limit, 32 << 20), 100 << 20)

    # Weights/biases: whole-array resident in VMEM, no per-step pipelining.
    vmem_full = pl.BlockSpec(memory_space=pltpu.MemorySpace.VMEM)

    out = pl.pallas_call(
        _cds_mlp_kernel,
        out_shape=jax.ShapeDtypeStruct((num_tiles, 1, block_b), jnp.float32),
        grid=(num_tiles,),
        in_specs=[pl.BlockSpec((block_b, n_in), lambda i: (i, 0))]
                 + [vmem_full] * 12,
        out_specs=pl.BlockSpec((None, 1, block_b), lambda i: (i, 0, 0)),
        compiler_params=pltpu.CompilerParams(
            dimension_semantics=("parallel",),
            vmem_limit_bytes=vmem_limit,
        ),
        cost_estimate=pl.CostEstimate(
            flops=flops, transcendentals=0, bytes_accessed=bytes_accessed),
    )(x, *flat)

    # (num_tiles, 1, block_b) row-slab -> (B, 1); tail rows (over-read) dropped.
    return out.reshape(-1)[:B].reshape(B, 1)


# ---------------------------------------------------------------------------
# Deterministic param construction + pure-JAX reference
# ---------------------------------------------------------------------------
def _init_linear(key, out_f, in_f):
    """PyTorch-style uniform(-1/sqrt(in), 1/sqrt(in)) init."""
    kw, kb = jax.random.split(key)
    bound = 1.0 / jnp.sqrt(jnp.float32(in_f))
    w = jax.random.uniform(kw, (out_f, in_f), jnp.float32, -bound, bound)
    b = jax.random.uniform(kb, (1, out_f), jnp.float32, -bound, bound)
    return w, b


def make_params(key, n_in, n_gene, n_pathway, n_h1, n_h2, n_h3):
    keys = jax.random.split(key, 7)
    mask = (jax.random.uniform(keys[0], (n_gene, n_in)) > 0.5).astype(jnp.float32)
    wg, bg = _init_linear(keys[1], n_gene, n_in)
    w1, b1 = _init_linear(keys[2], n_pathway, n_gene)
    w2, b2 = _init_linear(keys[3], n_h1, n_pathway)
    w3, b3 = _init_linear(keys[4], n_h2, n_h1)
    w4, b4 = _init_linear(keys[5], n_h3, n_h2)
    w5, b5 = _init_linear(keys[6], 1, n_h3)
    wg = wg * mask   # module __init__ pre-masks the gene weight
    return dict(mask=mask, wg=wg, bg=bg, w1=w1, b1=b1, w2=w2, b2=b2,
                w3=w3, b3=b3, w4=w4, b4=b4, w5=w5, b5=b5)


def reference_forward(x, p):
    h = jnp.maximum(x @ (p["wg"] * p["mask"]).T + p["bg"], 0.0)
    h = jnp.maximum(h @ p["w1"].T + p["b1"], 0.0)
    h = jnp.maximum(h @ p["w2"].T + p["b2"], 0.0)
    h = jnp.maximum(h @ p["w3"].T + p["b3"], 0.0)
    h = jnp.maximum(h @ p["w4"].T + p["b4"], 0.0)
    return h @ p["w5"].T + p["b5"]


if __name__ == "__main__":
    # Small shapes consistent with the module's forward.
    B, n_in, n_gene, n_pathway, n_h1, n_h2, n_h3 = 8, 16, 32, 24, 16, 16, 8

    key = jax.random.PRNGKey(0)
    kx, kp = jax.random.split(key)
    x = jax.random.normal(kx, (B, n_in), jnp.float32)
    params = make_params(kp, n_in, n_gene, n_pathway, n_h1, n_h2, n_h3)

    # One-time load-time prep (use weights_dtype=jnp.bfloat16 at realistic
    # gene/pathway sizes, especially on v7x's 64 MiB VMEM).
    prepared = prepare_params(params, weights_dtype=jnp.float32)

    out = jax.block_until_ready(cds_mlp_forward(x, prepared))
    ref = reference_forward(x, params)

    assert out.shape == (B, 1)
    # Default-precision TPU f32 matmuls run as bf16 passes on the MXU; the
    # kernel and the XLA reference may choose different pass counts, so the
    # comparison is deliberately loose (a real bug would be orders larger).
    assert jnp.allclose(out, ref, atol=5e-3, rtol=5e-3), (
        float(jnp.max(jnp.abs(out - ref))))

    print("KERNEL_OK")
</pallas_src>

<mosaic_0001>
module attributes {stable_mosaic.version = 11 : i64} {
  func.func @_cds_mlp_kernel(%arg0: i32, %arg1: memref<8x16xf32, #tpu.memory_space<vmem>>, %arg2: memref<16x128xf32, #tpu.memory_space<vmem>>, %arg3: memref<1x128xf32, #tpu.memory_space<vmem>>, %arg4: memref<128x128xf32, #tpu.memory_space<vmem>>, %arg5: memref<1x128xf32, #tpu.memory_space<vmem>>, %arg6: memref<128x128xf32, #tpu.memory_space<vmem>>, %arg7: memref<1x128xf32, #tpu.memory_space<vmem>>, %arg8: memref<128x128xf32, #tpu.memory_space<vmem>>, %arg9: memref<1x128xf32, #tpu.memory_space<vmem>>, %arg10: memref<128x128xf32, #tpu.memory_space<vmem>>, %arg11: memref<1x128xf32, #tpu.memory_space<vmem>>, %arg12: memref<1x128xf32, #tpu.memory_space<vmem>>, %arg13: memref<1x1xf32, #tpu.memory_space<vmem>>, %arg14: memref<1x1x8xf32, #tpu.memory_space<vmem>>) attributes {dimension_semantics = [#tpu.dimension_semantics<parallel>], iteration_bounds = array<i64: 1>, scalar_prefetch = 0 : i64, scratch_operands = 0 : i64, tpu.core_type = #tpu.core_type<tc>, window_params = [{transform_indices = @transform_0, window_bounds = array<i64: 8, 16>}, {pipeline_mode = #tpu.pipeline_mode<synchronous>, transform_indices = @transform_1, window_bounds = array<i64: 16, 128>}, {pipeline_mode = #tpu.pipeline_mode<synchronous>, transform_indices = @transform_2, window_bounds = array<i64: 1, 128>}, {pipeline_mode = #tpu.pipeline_mode<synchronous>, transform_indices = @transform_3, window_bounds = array<i64: 128, 128>}, {pipeline_mode = #tpu.pipeline_mode<synchronous>, transform_indices = @transform_4, window_bounds = array<i64: 1, 128>}, {pipeline_mode = #tpu.pipeline_mode<synchronous>, transform_indices = @transform_5, window_bounds = array<i64: 128, 128>}, {pipeline_mode = #tpu.pipeline_mode<synchronous>, transform_indices = @transform_6, window_bounds = array<i64: 1, 128>}, {pipeline_mode = #tpu.pipeline_mode<synchronous>, transform_indices = @transform_7, window_bounds = array<i64: 128, 128>}, {pipeline_mode = #tpu.pipeline_mode<synchronous>, transform_indices = @transform_8, window_bounds = array<i64: 1, 128>}, {pipeline_mode = #tpu.pipeline_mode<synchronous>, transform_indices = @transform_9, window_bounds = array<i64: 128, 128>}, {pipeline_mode = #tpu.pipeline_mode<synchronous>, transform_indices = @transform_10, window_bounds = array<i64: 1, 128>}, {pipeline_mode = #tpu.pipeline_mode<synchronous>, transform_indices = @transform_11, window_bounds = array<i64: 1, 128>}, {pipeline_mode = #tpu.pipeline_mode<synchronous>, transform_indices = @transform_12, window_bounds = array<i64: 1, 1>}, {transform_indices = @transform_13, window_bounds = array<i64: 1, 1, 8>}]} {
    %c0 = arith.constant 0 : index
    %c0_0 = arith.constant 0 : index
    %0 = vector.load %arg1[%c0, %c0_0] : memref<8x16xf32, #tpu.memory_space<vmem>>, vector<8x16xf32>
    %c0_1 = arith.constant 0 : index
    %c0_2 = arith.constant 0 : index
    %1 = vector.load %arg2[%c0_1, %c0_2] : memref<16x128xf32, #tpu.memory_space<vmem>>, vector<16x128xf32>
    %cst = arith.constant dense<0.000000e+00> : vector<8x128xf32>
    %2 = tpu.matmul %0, %1, %cst {dimension_numbers = #tpu.dot_dimension_numbers<[1], [0], [0], [1], [0, 0, 1, 1], [], []>} : vector<8x16xf32>, vector<16x128xf32>, vector<8x128xf32> -> vector<8x128xf32>
    %c0_3 = arith.constant 0 : index
    %c0_4 = arith.constant 0 : index
    %3 = vector.load %arg3[%c0_3, %c0_4] : memref<1x128xf32, #tpu.memory_space<vmem>>, vector<1x128xf32>
    %4 = vector.broadcast %3 : vector<1x128xf32> to vector<8x128xf32>
    %5 = arith.addf %2, %4 : vector<8x128xf32>
    %cst_5 = arith.constant 0.000000e+00 : f32
    %6 = vector.broadcast %cst_5 : f32 to vector<8x128xf32>
    %7 = arith.maximumf %5, %6 : vector<8x128xf32>
    %c0_6 = arith.constant 0 : index
    %c0_7 = arith.constant 0 : index
    %8 = vector.load %arg4[%c0_6, %c0_7] : memref<128x128xf32, #tpu.memory_space<vmem>>, vector<128x128xf32>
    %cst_8 = arith.constant dense<0.000000e+00> : vector<8x128xf32>
    %9 = tpu.matmul %7, %8, %cst_8 {dimension_numbers = #tpu.dot_dimension_numbers<[1], [0], [0], [1], [0, 0, 1, 1], [], []>} : vector<8x128xf32>, vector<128x128xf32>, vector<8x128xf32> -> vector<8x128xf32>
    %c0_9 = arith.constant 0 : index
    %c0_10 = arith.constant 0 : index
    %10 = vector.load %arg5[%c0_9, %c0_10] : memref<1x128xf32, #tpu.memory_space<vmem>>, vector<1x128xf32>
    %11 = vector.broadcast %10 : vector<1x128xf32> to vector<8x128xf32>
    %12 = arith.addf %9, %11 : vector<8x128xf32>
    %cst_11 = arith.constant 0.000000e+00 : f32
    %13 = vector.broadcast %cst_11 : f32 to vector<8x128xf32>
    %14 = arith.maximumf %12, %13 : vector<8x128xf32>
    %c0_12 = arith.constant 0 : index
    %c0_13 = arith.constant 0 : index
    %15 = vector.load %arg6[%c0_12, %c0_13] : memref<128x128xf32, #tpu.memory_space<vmem>>, vector<128x128xf32>
    %cst_14 = arith.constant dense<0.000000e+00> : vector<8x128xf32>
    %16 = tpu.matmul %14, %15, %cst_14 {dimension_numbers = #tpu.dot_dimension_numbers<[1], [0], [0], [1], [0, 0, 1, 1], [], []>} : vector<8x128xf32>, vector<128x128xf32>, vector<8x128xf32> -> vector<8x128xf32>
    %c0_15 = arith.constant 0 : index
    %c0_16 = arith.constant 0 : index
    %17 = vector.load %arg7[%c0_15, %c0_16] : memref<1x128xf32, #tpu.memory_space<vmem>>, vector<1x128xf32>
    %18 = vector.broadcast %17 : vector<1x128xf32> to vector<8x128xf32>
    %19 = arith.addf %16, %18 : vector<8x128xf32>
    %cst_17 = arith.constant 0.000000e+00 : f32
    %20 = vector.broadcast %cst_17 : f32 to vector<8x128xf32>
    %21 = arith.maximumf %19, %20 : vector<8x128xf32>
    %c0_18 = arith.constant 0 : index
    %c0_19 = arith.constant 0 : index
    %22 = vector.load %arg8[%c0_18, %c0_19] : memref<128x128xf32, #tpu.memory_space<vmem>>, vector<128x128xf32>
    %cst_20 = arith.constant dense<0.000000e+00> : vector<8x128xf32>
    %23 = tpu.matmul %21, %22, %cst_20 {dimension_numbers = #tpu.dot_dimension_numbers<[1], [0], [0], [1], [0, 0, 1, 1], [], []>} : vector<8x128xf32>, vector<128x128xf32>, vector<8x128xf32> -> vector<8x128xf32>
    %c0_21 = arith.constant 0 : index
    %c0_22 = arith.constant 0 : index
    %24 = vector.load %arg9[%c0_21, %c0_22] : memref<1x128xf32, #tpu.memory_space<vmem>>, vector<1x128xf32>
    %25 = vector.broadcast %24 : vector<1x128xf32> to vector<8x128xf32>
    %26 = arith.addf %23, %25 : vector<8x128xf32>
    %cst_23 = arith.constant 0.000000e+00 : f32
    %27 = vector.broadcast %cst_23 : f32 to vector<8x128xf32>
    %28 = arith.maximumf %26, %27 : vector<8x128xf32>
    %c0_24 = arith.constant 0 : index
    %c0_25 = arith.constant 0 : index
    %29 = vector.load %arg10[%c0_24, %c0_25] : memref<128x128xf32, #tpu.memory_space<vmem>>, vector<128x128xf32>
    %cst_26 = arith.constant dense<0.000000e+00> : vector<8x128xf32>
    %30 = tpu.matmul %28, %29, %cst_26 {dimension_numbers = #tpu.dot_dimension_numbers<[1], [0], [0], [1], [0, 0, 1, 1], [], []>} : vector<8x128xf32>, vector<128x128xf32>, vector<8x128xf32> -> vector<8x128xf32>
    %c0_27 = arith.constant 0 : index
    %c0_28 = arith.constant 0 : index
    %31 = vector.load %arg11[%c0_27, %c0_28] : memref<1x128xf32, #tpu.memory_space<vmem>>, vector<1x128xf32>
    %32 = vector.broadcast %31 : vector<1x128xf32> to vector<8x128xf32>
    %33 = arith.addf %30, %32 : vector<8x128xf32>
    %cst_29 = arith.constant 0.000000e+00 : f32
    %34 = vector.broadcast %cst_29 : f32 to vector<8x128xf32>
    %35 = arith.maximumf %33, %34 : vector<8x128xf32>
    %c0_30 = arith.constant 0 : index
    %c0_31 = arith.constant 0 : index
    %36 = vector.load %arg12[%c0_30, %c0_31] : memref<1x128xf32, #tpu.memory_space<vmem>>, vector<1x128xf32>
    %cst_32 = arith.constant dense<0.000000e+00> : vector<1x8xf32>
    %37 = tpu.matmul %36, %35, %cst_32 {dimension_numbers = #tpu.dot_dimension_numbers<[1], [1], [0], [0], [0, 0, 1, 0], [], []>} : vector<1x128xf32>, vector<8x128xf32>, vector<1x8xf32> -> vector<1x8xf32>
    %c0_33 = arith.constant 0 : index
    %c0_34 = arith.constant 0 : index
    %38 = vector.load %arg13[%c0_33, %c0_34] : memref<1x1xf32, #tpu.memory_space<vmem>>, vector<1x1xf32>
    %39 = vector.broadcast %38 : vector<1x1xf32> to vector<1x8xf32>
    %40 = arith.addf %37, %39 : vector<1x8xf32>
    %c0_35 = arith.constant 0 : index
    %c0_36 = arith.constant 0 : index
    %c0_37 = arith.constant 0 : index
    %41 = vector.load %arg14[%c0_35, %c0_36, %c0_37] : memref<1x1x8xf32, #tpu.memory_space<vmem>>, vector<1x1x8xf32>
    %42 = vector.shape_cast %41 : vector<1x1x8xf32> to vector<1x8xf32>
    %43 = vector.shape_cast %40 : vector<1x8xf32> to vector<1x1x8xf32>
    tpu.vector_store %arg14[%c0_35, %c0_36, %c0_37], %43 {strides = array<i32>} : memref<1x1x8xf32, #tpu.memory_space<vmem>>, vector<1x1x8xf32>,
    return
  }
  func.func @transform_0(%arg0: i32) -> (i32, i32) {
    %c0_i32 = arith.constant 0 : i32
    %c0_i32_0 = arith.constant 0 : i32
    return %arg0, %c0_i32 : i32, i32
  }
  func.func @transform_1(%arg0: i32) -> (i32, i32) {
    %c0_i32 = arith.constant 0 : i32
    %c0_i32_0 = arith.constant 0 : i32
    %c0_i32_1 = arith.constant 0 : i32
    return %c0_i32, %c0_i32_0 : i32, i32
  }
  func.func @transform_2(%arg0: i32) -> (i32, i32) {
    %c0_i32 = arith.constant 0 : i32
    %c0_i32_0 = arith.constant 0 : i32
    %c0_i32_1 = arith.constant 0 : i32
    return %c0_i32, %c0_i32_0 : i32, i32
  }
  func.func @transform_3(%arg0: i32) -> (i32, i32) {
    %c0_i32 = arith.constant 0 : i32
    %c0_i32_0 = arith.constant 0 : i32
    %c0_i32_1 = arith.constant 0 : i32
    return %c0_i32, %c0_i32_0 : i32, i32
  }
  func.func @transform_4(%arg0: i32) -> (i32, i32) {
    %c0_i32 = arith.constant 0 : i32
    %c0_i32_0 = arith.constant 0 : i32
    %c0_i32_1 = arith.constant 0 : i32
    return %c0_i32, %c0_i32_0 : i32, i32
  }
  func.func @transform_5(%arg0: i32) -> (i32, i32) {
    %c0_i32 = arith.constant 0 : i32
    %c0_i32_0 = arith.constant 0 : i32
    %c0_i32_1 = arith.constant 0 : i32
    return %c0_i32, %c0_i32_0 : i32, i32
  }
  func.func @transform_6(%arg0: i32) -> (i32, i32) {
    %c0_i32 = arith.constant 0 : i32
    %c0_i32_0 = arith.constant 0 : i32
    %c0_i32_1 = arith.constant 0 : i32
    return %c0_i32, %c0_i32_0 : i32, i32
  }
  func.func @transform_7(%arg0: i32) -> (i32, i32) {
    %c0_i32 = arith.constant 0 : i32
    %c0_i32_0 = arith.constant 0 : i32
    %c0_i32_1 = arith.constant 0 : i32
    return %c0_i32, %c0_i32_0 : i32, i32
  }
  func.func @transform_8(%arg0: i32) -> (i32, i32) {
    %c0_i32 = arith.constant 0 : i32
    %c0_i32_0 = arith.constant 0 : i32
    %c0_i32_1 = arith.constant 0 : i32
    return %c0_i32, %c0_i32_0 : i32, i32
  }
  func.func @transform_9(%arg0: i32) -> (i32, i32) {
    %c0_i32 = arith.constant 0 : i32
    %c0_i32_0 = arith.constant 0 : i32
    %c0_i32_1 = arith.constant 0 : i32
    return %c0_i32, %c0_i32_0 : i32, i32
  }
  func.func @transform_10(%arg0: i32) -> (i32, i32) {
    %c0_i32 = arith.constant 0 : i32
    %c0_i32_0 = arith.constant 0 : i32
    %c0_i32_1 = arith.constant 0 : i32
    return %c0_i32, %c0_i32_0 : i32, i32
  }
  func.func @transform_11(%arg0: i32) -> (i32, i32) {
    %c0_i32 = arith.constant 0 : i32
    %c0_i32_0 = arith.constant 0 : i32
    %c0_i32_1 = arith.constant 0 : i32
    return %c0_i32, %c0_i32_0 : i32, i32
  }
  func.func @transform_12(%arg0: i32) -> (i32, i32) {
    %c0_i32 = arith.constant 0 : i32
    %c0_i32_0 = arith.constant 0 : i32
    %c0_i32_1 = arith.constant 0 : i32
    return %c0_i32, %c0_i32_0 : i32, i32
  }
  func.func @transform_13(%arg0: i32) -> (i32, i32, i32) {
    %c0_i32 = arith.constant 0 : i32
    %c0_i32_0 = arith.constant 0 : i32
    %c0_i32_1 = arith.constant 0 : i32
    return %arg0, %c0_i32, %c0_i32_0 : i32, i32, i32
  }
}

</mosaic_0001>

<bundles_post_ra>
// kernel: tpu_custom_call.1
= control target key start
LH: loop header
LB: loop body
LE: loop exit
PB: predicated region body
PF: predicated region fallthrough
CT: control target
= control target key end

     0   :  { %s1301_s0 = inlined_call_operand.hbm [shape: f32[8,16], index: 0, kind: input, shape index: {}]   ;;  %s1302_s1 = inlined_call_operand.hbm [shape: f32[16,128], index: 1, kind: input, shape index: {}]   ;;  %s1303_s2 = inlined_call_operand.vmem [shape: f32[1,128], index: 2, kind: input, shape index: {}]   ;;  %s1304_s3 = inlined_call_operand.hbm [shape: f32[128,128], index: 3, kind: input, shape index: {}]   ;;  %s1305_s4 = inlined_call_operand.vmem [shape: f32[1,128], index: 4, kind: input, shape index: {}]   ;;  %s1306_s5 = inlined_call_operand.hbm [shape: f32[128,128], index: 5, kind: input, shape index: {}]   ;;  %s1307_s6 = inlined_call_operand.vmem [shape: f32[1,128], index: 6, kind: input, shape index: {}]   ;;  %s1308_s7 = inlined_call_operand.hbm [shape: f32[128,128], index: 7, kind: input, shape index: {}]   ;;  %s1309_s8 = inlined_call_operand.vmem [shape: f32[1,128], index: 8, kind: input, shape index: {}]   ;;  %s1310_s9 = inlined_call_operand.hbm [shape: f32[128,128], index: 9, kind: input, shape index: {}]   ;;  %s1311_s10 = inlined_call_operand.vmem [shape: f32[1,128], index: 10, kind: input, shape index: {}]   ;;  %s1312_s11 = inlined_call_operand.vmem [shape: f32[1,128], index: 11, kind: input, shape index: {}]   ;;  %s1313_s12 = inlined_call_operand.<no memory space> [shape: f32[1,1], index: 12, kind: input, shape index: {}]   ;;  %s1314_s13 = inlined_call_operand.hbm [shape: f32[1,1,8], index: 13, kind: output, shape index: {}]  }
   0x1   :  { %v18_v0 = vstv %s1313_s12 }
   0x2   :  { %19 = vst [vmem:[#allocation2] sm:$0x1] %v18_v0 }
   0x3   :  { %20 = vsyncpa [#allocation4], 0 }
   0x4   :  { %21 = vsyncpa [#allocation7], 0 }
   0x5   :  { %22 = vsyncpa [#allocation10], 0 }
   0x6   :  { %23 = vsyncpa [#allocation13], 0 }
   0x7   :  { %24 = vsyncpa [#allocation5], 0  ;;  %s1083_s27 = smov [#allocation6]  }
   0x8   :  { %s40_s28 = sshll.u32 %s1083_s27, 4  ;;  %s41_s28 = int_to_ptr.vmem [resolvable:$true] %s40_s28 }
   0x9   :  { %s941_s29 = scalar_lea.vmem %s41_s28, 256  ;;  %p946_p1 = scmp.lt.s32.totalorder %s41_s28, %s41_s28 }
   0xa   :  { %p942_p0 = scmp.ne.s32.totalorder %s41_s28, %s941_s29  ;;  %p947_p2 = scmp.lt.s32.totalorder %s941_s29, %s941_s29 }
   0xc   :  { %p948_p3 = por %p947_p2, %p946_p1 }
   0xe   :  { %p949_p4 = pnand %p948_p3, %p942_p0 }
  0x10   :  { %952 = shalt.err (!%p949_p4)
}
  0x11   :  { %s1084_s30 = smov 128   ;;  %s1085_s14 = smov 8  }
  0x12   :  { %46 = dma.hbm_to_vmem [thread:$0]  %s1302_s1, 256, %s41_s28, [#allocation7], %s1084_s30, %s1084_s30, %s1085_s14  }
  0x13   :  { %s1086_s16 = smov [#allocation9]   ;;  %s1087_s18 = smov [#allocation3]  }
  0x14   :  { %s68_s17 = sshll.u32 %s1086_s16, 4  ;;  %s31_s19 = sshll.u32 %s1087_s18, 4  ;;  %s69_s17 = int_to_ptr.vmem [resolvable:$true] %s68_s17  ;;  %s32_s19 = int_to_ptr.vmem [resolvable:$true] %s31_s19 }
  0x15   :  { %s961_s20 = scalar_lea.vmem %s69_s17, 2048  ;;  %p966_p6 = scmp.lt.s32.totalorder %s69_s17, %s69_s17 }
  0x16   :  { %p962_p5 = scmp.ne.s32.totalorder %s69_s17, %s961_s20  ;;  %p967_p7 = scmp.lt.s32.totalorder %s961_s20, %s961_s20 }
  0x18   :  { %p968_p8 = por %p967_p7, %p966_p6 }
  0x1a   :  { %p969_p9 = pnand %p968_p8, %p962_p5 }
  0x1c   :  { %972 = shalt.err (!%p969_p9)
}
  0x1d   :  { %74 = dma.hbm_to_vmem [thread:$0]  %s1306_s5, 2048, %s69_s17, [#allocation10], %s1084_s30, %s1084_s30, %s1085_s14  }
  0x1e   :  { %s981_s1 = scalar_lea.vmem %s32_s19, 128  ;;  %p986_p11 = scmp.lt.s32.totalorder %s32_s19, %s32_s19 }
  0x1f   :  { %p982_p10 = scmp.ne.s32.totalorder %s32_s19, %s981_s1  ;;  %p987_p12 = scmp.lt.s32.totalorder %s981_s1, %s981_s1 }
  0x21   :  { %p988_p13 = por %p987_p12, %p986_p11 }
  0x23   :  { %p989_p0 = pnand %p988_p13, %p982_p10 }
  0x25   :  { %992 = shalt.err (!%p989_p0)
}
  0x26   :  { %34 = dma.hbm_to_vmem [thread:$0]  %s1301_s0, 128, %s32_s19, [#allocation4]  }
  0x27   :  { %s1088_s25 = smov [#allocation8]   ;;  %s1089_s27 = smov [#allocation11]  }
  0x28   :  { %s54_s26 = sshll.u32 %s1088_s25, 4  ;;  %s82_s28 = sshll.u32 %s1089_s27, 4  ;;  %s55_s26 = int_to_ptr.vmem [resolvable:$true] %s54_s26  ;;  %s83_s28 = int_to_ptr.vmem [resolvable:$true] %s82_s28 }
  0x29   :  { %s1001_s29 = scalar_lea.vmem %s55_s26, 2048  ;;  %p1006_p2 = scmp.lt.s32.totalorder %s55_s26, %s55_s26 }
  0x2a   :  { %p1002_p1 = scmp.ne.s32.totalorder %s55_s26, %s1001_s29  ;;  %p1007_p3 = scmp.lt.s32.totalorder %s1001_s29, %s1001_s29 }
  0x2c   :  { %p1008_p4 = por %p1007_p3, %p1006_p2 }
  0x2e   :  { %p1009_p5 = pnand %p1008_p4, %p1002_p1 }
  0x30   :  { %1012 = shalt.err (!%p1009_p5)
}
  0x31   :  { %60 = dma.hbm_to_vmem [thread:$0]  %s1304_s3, 2048, %s55_s26, [#allocation7], %s1084_s30, %s1084_s30, %s1085_s14  }
  0x32   :  { %s1021_s0 = scalar_lea.vmem %s83_s28, 2048  ;;  %p1026_p7 = scmp.lt.s32.totalorder %s83_s28, %s83_s28 }
  0x33   :  { %p1022_p6 = scmp.ne.s32.totalorder %s83_s28, %s1021_s0  ;;  %p1027_p8 = scmp.lt.s32.totalorder %s1021_s0, %s1021_s0 }
  0x35   :  { %p1028_p9 = por %p1027_p8, %p1026_p7 }
  0x37   :  { %p1029_p10 = pnand %p1028_p9, %p1022_p6 }
  0x39   :  { %1032 = shalt.err (!%p1029_p10)
}
  0x3a   :  { %88 = dma.hbm_to_vmem [thread:$0]  %s1308_s7, 2048, %s83_s28, [#allocation10], %s1084_s30, %s1084_s30, %s1085_s14  }
  0x3b   :  { %s1090_s17 = smov [#allocation12]  }
  0x3c   :  { %s96_s18 = sshll.u32 %s1090_s17, 4  ;;  %s97_s18 = int_to_ptr.vmem [resolvable:$true] %s96_s18 }
  0x3d   :  { %s1041_s19 = scalar_lea.vmem %s97_s18, 2048  ;;  %p1046_p12 = scmp.lt.s32.totalorder %s97_s18, %s97_s18 }
  0x3e   :  { %p1042_p11 = scmp.ne.s32.totalorder %s97_s18, %s1041_s19  ;;  %p1047_p13 = scmp.lt.s32.totalorder %s1041_s19, %s1041_s19 }
  0x40   :  { %p1048_p0 = por %p1047_p13, %p1046_p12 }
  0x42   :  { %p1049_p1 = pnand %p1048_p0, %p1042_p11 }
  0x44   :  { %1052 = shalt.err (!%p1049_p1)
}
  0x45   :  { %102 = dma.hbm_to_vmem [thread:$0]  %s1310_s9, 2048, %s97_s18, [#allocation13], %s1084_s30, %s1084_s30, %s1085_s14  }
  0x46   :  { %1073 = dma.done.wait [#allocation4], 128  }
  0x47   :  { %1074 = vsyncadd [#allocation4], 4294967168 }
  0x48   :  { %1075 = dma.done.wait [#allocation7], 2304  }
  0x49   :  { %1076 = vsyncadd [#allocation7], 4294964992 }
  0x4a   :  { %1077 = dma.done.wait [#allocation10], 4096  }
  0x4b   :  { %1078 = vsyncadd [#allocation10], 4294963200 }
  0x4c   :  { %1079 = dma.done.wait [#allocation13], 2048  }
  0x4d   :  { %1080 = vsyncadd [#allocation13], 4294965248  ;;  %v1091_v1 = vmov 0.0   ;;  %vm1092_vm0 = vmmov 0   ;;  %v129_v2 = vld [vmem:[#allocation6 + $0x8] sm:$0xff]  ;;  %v128_v3 = vld [vmem:[#allocation6] sm:$0xff] }
  0x4e   :  { %768 = vmatprep.subr.mxu0 %v1091_v1  ;;  %772 = vmatprep.mubr.msk.f32.mxu0 %vm1092_vm0, %v1091_v1  ;;  %v127_v4 = vld [vmem:[#allocation3] sm:$0xff]  ;;  %vm137_vm1 = vcmask 130048   ;;  %v227_v5 = vld [vmem:[#allocation8 + $0x78] sm:$0xff]  ;;  %v226_v6 = vld [vmem:[#allocation8 + $0x70] sm:$0xff]  ;;  %s1094_s24 = smov [#allocation14]   ;;  %vm669_vm2 = vcmask 57344  }
  0x4f   :  { %775 = vmatprep.subr.mxu1 %v1091_v1  ;;  %807 = vmatprep.mubr.msk.f32.mxu1 %vm1092_vm0, %v1091_v1  ;;  %v225_v7 = vld [vmem:[#allocation8 + $0x68] sm:$0xff]  ;;  %v224_v8 = vld [vmem:[#allocation8 + $0x60] sm:$0xff]  ;;  %v223_v9 = vld [vmem:[#allocation8 + $0x58] sm:$0xff]  ;;  %s677_s25 = sshll.u32 %s1094_s24, 4  ;;  %s678_s25 = int_to_ptr.vmem [resolvable:$true] %s677_s25 }
  0x50   :  { %769 = vmatpush3.msra.mxu0 %v129_v2  ;;  %776 = vmatpush3.msra.mxu1 %v227_v5  ;;  %v222_v10 = vld [vmem:[#allocation8 + $0x50] sm:$0xff]  ;;  %v221_v11 = vld [vmem:[#allocation8 + $0x48] sm:$0xff]  ;;  %v220_v12 = vld [vmem:[#allocation8 + $0x40] sm:$0xff]  ;;  %s1057_s26 = scalar_lea.vmem %s678_s25, 32  ;;  %p1058_p3 = scmp.lt.s32.totalorder %s678_s25, %s678_s25 }
  0x51   :  { %770 = vmatprep.subr.mxu0 %v1091_v1  ;;  %777 = vmatprep.subr.mxu1 %v1091_v1  ;;  %v219_v13 = vld [vmem:[#allocation8 + $0x38] sm:$0xff]  ;;  %v218_v14 = vld [vmem:[#allocation8 + $0x30] sm:$0xff]  ;;  %v217_v15 = vld [vmem:[#allocation8 + $0x28] sm:$0xff] }
  0x52   :  { %771 = vmatpush3.msra.mxu0 %v128_v3  ;;  %778 = vmatpush3.msra.mxu1 %v226_v6  ;;  %v216_v16 = vld [vmem:[#allocation8 + $0x20] sm:$0xff]  ;;  %v215_v17 = vld [vmem:[#allocation8 + $0x18] sm:$0xff]  ;;  %v214_v18 = vld [vmem:[#allocation8 + $0x10] sm:$0xff] }
  0x53   :  { %773 = vmatmul.mubr.msk.f32.vlgmr.msra.gmra.mxu0 %vm137_vm1, %v127_v4  ;;  %779 = vmatprep.subr.mxu1 %v1091_v1  ;;  %v213_v19 = vld [vmem:[#allocation8 + $0x8] sm:$0xff]  ;;  %v212_v20 = vld [vmem:[#allocation8] sm:$0xff]  ;;  %v321_v21 = vld [vmem:[#allocation9 + $0x78] sm:$0xff] }
  0x54   :  { %810 = vmatprep.subr.mxu0 %v1091_v1  ;;  %780 = vmatpush3.msra.mxu1 %v225_v7  ;;  %v320_v22 = vld [vmem:[#allocation9 + $0x70] sm:$0xff]  ;;  %v319_v23 = vld [vmem:[#allocation9 + $0x68] sm:$0xff]  ;;  %v318_v24 = vld [vmem:[#allocation9 + $0x60] sm:$0xff] }
  0x55   :  { %842 = vmatprep.mubr.msk.f32.mxu0 %vm1092_vm0, %v1091_v1  ;;  %781 = vmatprep.subr.mxu1 %v1091_v1  ;;  %v317_v25 = vld [vmem:[#allocation9 + $0x58] sm:$0xff]  ;;  %v316_v26 = vld [vmem:[#allocation9 + $0x50] sm:$0xff]  ;;  %v315_v27 = vld [vmem:[#allocation9 + $0x48] sm:$0xff] }
  0x56   :  { %782 = vmatpush3.msra.mxu1 %v224_v8  ;;  %811 = vmatpush3.msra.mxu0 %v321_v21  ;;  %v314_v28 = vld [vmem:[#allocation9 + $0x40] sm:$0xff]  ;;  %v313_v29 = vld [vmem:[#allocation9 + $0x38] sm:$0xff]  ;;  %v312_v30 = vld [vmem:[#allocation9 + $0x30] sm:$0xff] }
  0x57   :  { %783 = vmatprep.subr.mxu1 %v1091_v1  ;;  %812 = vmatprep.subr.mxu0 %v1091_v1  ;;  %v311_v31 = vld [vmem:[#allocation9 + $0x28] sm:$0xff]  ;;  %v310_v32 = vld [vmem:[#allocation9 + $0x20] sm:$0xff]  ;;  %v309_v33 = vld [vmem:[#allocation9 + $0x18] sm:$0xff] }
  0x58   :  { %784 = vmatpush3.msra.mxu1 %v223_v9  ;;  %813 = vmatpush3.msra.mxu0 %v320_v22  ;;  %v689_v34 = vld [vmem:[%s1303_s2] ss:$0 sm:$0xff]  ;;  %v308_v39 = vld [vmem:[#allocation9 + $0x10] sm:$0xff]  ;;  %v307_v40 = vld [vmem:[#allocation9 + $0x8] sm:$0xff] }
  0x59   :  { %785 = vmatprep.subr.mxu1 %v1091_v1  ;;  %814 = vmatprep.subr.mxu0 %v1091_v1  ;;  %v306_v41 = vld [vmem:[#allocation9] sm:$0xff]  ;;  %v415_v42 = vld [vmem:[#allocation11 + $0x78] sm:$0xff]  ;;  %v414_v43 = vld [vmem:[#allocation11 + $0x70] sm:$0xff] }
  0x5a   :  { %786 = vmatpush3.msra.mxu1 %v222_v10  ;;  %815 = vmatpush3.msra.mxu0 %v319_v23  ;;  %v413_v44 = vld [vmem:[#allocation11 + $0x68] sm:$0xff]  ;;  %v412_v45 = vld [vmem:[#allocation11 + $0x60] sm:$0xff]  ;;  %v411_v46 = vld [vmem:[#allocation11 + $0x58] sm:$0xff] }
  0x5b   :  { %787 = vmatprep.subr.mxu1 %v1091_v1  ;;  %816 = vmatprep.subr.mxu0 %v1091_v1  ;;  %v410_v47 = vld [vmem:[#allocation11 + $0x50] sm:$0xff]  ;;  %v409_v48 = vld [vmem:[#allocation11 + $0x48] sm:$0xff]  ;;  %v408_v49 = vld [vmem:[#allocation11 + $0x40] sm:$0xff] }
  0x5c   :  { %788 = vmatpush3.msra.mxu1 %v221_v11  ;;  %817 = vmatpush3.msra.mxu0 %v318_v24  ;;  %v407_v50 = vld [vmem:[#allocation11 + $0x38] sm:$0xff]  ;;  %v406_v51 = vld [vmem:[#allocation11 + $0x30] sm:$0xff]  ;;  %v405_v52 = vld [vmem:[#allocation11 + $0x28] sm:$0xff] }
  0x5d   :  { %789 = vmatprep.subr.mxu1 %v1091_v1  ;;  %818 = vmatprep.subr.mxu0 %v1091_v1  ;;  %v404_v53 = vld [vmem:[#allocation11 + $0x20] sm:$0xff]  ;;  %v403_v54 = vld [vmem:[#allocation11 + $0x18] sm:$0xff]  ;;  %v402_v60 = vld [vmem:[#allocation11 + $0x10] sm:$0xff] }
  0x5e   :  { %790 = vmatpush3.msra.mxu1 %v220_v12  ;;  %819 = vmatpush3.msra.mxu0 %v317_v25  ;;  %v691_v55 = vld [vmem:[%s1305_s4] ss:$0 sm:$0xff]  ;;  %v401_v61 = vld [vmem:[#allocation11 + $0x8] sm:$0xff]  ;;  %v509_v63 = vld [vmem:[#allocation12 + $0x78] sm:$0xff] }
  0x5f   :  { %791 = vmatprep.subr.mxu1 %v1091_v1  ;;  %820 = vmatprep.subr.mxu0 %v1091_v1  ;;  %v400_v62 = vld [vmem:[#allocation11] sm:$0xff]  ;;  %v508_v0 = vld [vmem:[#allocation12 + $0x70] sm:$0xff]  ;;  %v507_v2 = vld [vmem:[#allocation12 + $0x68] sm:$0xff] }
  0x60   :  { %792 = vmatpush3.msra.mxu1 %v219_v13  ;;  %821 = vmatpush3.msra.mxu0 %v316_v26  ;;  %v506_v3 = vld [vmem:[#allocation12 + $0x60] sm:$0xff]  ;;  %v505_v4 = vld [vmem:[#allocation12 + $0x58] sm:$0xff]  ;;  %v504_v5 = vld [vmem:[#allocation12 + $0x50] sm:$0xff] }
  0x61   :  { %793 = vmatprep.subr.mxu1 %v1091_v1  ;;  %822 = vmatprep.subr.mxu0 %v1091_v1  ;;  %v503_v6 = vld [vmem:[#allocation12 + $0x48] sm:$0xff]  ;;  %v502_v7 = vld [vmem:[#allocation12 + $0x40] sm:$0xff]  ;;  %v501_v8 = vld [vmem:[#allocation12 + $0x38] sm:$0xff] }
  0x62   :  { %794 = vmatpush3.msra.mxu1 %v218_v14  ;;  %823 = vmatpush3.msra.mxu0 %v315_v27  ;;  %v500_v9 = vld [vmem:[#allocation12 + $0x30] sm:$0xff]  ;;  %v499_v10 = vld [vmem:[#allocation12 + $0x28] sm:$0xff]  ;;  %v498_v11 = vld [vmem:[#allocation12 + $0x20] sm:$0xff]  ;;  %v1093_v27 = vmov 0  }
  0x63   :  { %795 = vmatprep.subr.mxu1 %v1091_v1  ;;  %824 = vmatprep.subr.mxu0 %v1091_v1  ;;  %v497_v12 = vld [vmem:[#allocation12 + $0x18] sm:$0xff]  ;;  %v692_v13 = vld [vmem:[%s1307_s6] ss:$0 sm:$0xff] }
  0x64   :  { %796 = vmatpush3.msra.mxu1 %v217_v15  ;;  %825 = vmatpush3.msra.mxu0 %v314_v28  ;;  %v693_v21 = vld [vmem:[%s1309_s8] ss:$0 sm:$0xff] }
  0x65   :  { %797 = vmatprep.subr.mxu1 %v1091_v1  ;;  %826 = vmatprep.subr.mxu0 %v1091_v1  ;;  %v589_v26 = vld [vmem:[#allocation2] sm:$0x1] }
  0x66   :  { %798 = vmatpush3.msra.mxu1 %v216_v16  ;;  %827 = vmatpush3.msra.mxu0 %v313_v29  ;;  %v694_v28 = vld [vmem:[%s1311_s10] ss:$0 sm:$0xff]  ;;  %s1053_s10 = scalar_lea.vmem %s678_s25, 16 }
  0x67   :  { %799 = vmatprep.subr.mxu1 %v1091_v1  ;;  %828 = vmatprep.subr.mxu0 %v1091_v1  ;;  %p1054_p2 = scmp.ne.s32.totalorder %s678_s25, %s1053_s10  ;;  %p1059_p4 = scmp.lt.s32.totalorder %s1057_s26, %s1053_s10 }
  0x68   :  { %800 = vmatpush3.msra.mxu1 %v215_v17  ;;  %829 = vmatpush3.msra.mxu0 %v312_v30 }
  0x69   :  { %801 = vmatprep.subr.mxu1 %v1091_v1  ;;  %830 = vmatprep.subr.mxu0 %v1091_v1  ;;  %p1060_p5 = por %p1059_p4, %p1058_p3 }
  0x6a   :  { %802 = vmatpush3.msra.mxu1 %v214_v18  ;;  %831 = vmatpush3.msra.mxu0 %v311_v31  ;;  %v496_v18 = vld [vmem:[#allocation12 + $0x10] sm:$0xff] }
  0x6b   :  { %803 = vmatprep.subr.mxu1 %v1091_v1  ;;  %832 = vmatprep.subr.mxu0 %v1091_v1  ;;  %p1061_p6 = pnand %p1060_p5, %p1054_p2 }
  0x6c   :  { %804 = vmatpush3.msra.mxu1 %v213_v19  ;;  %833 = vmatpush3.msra.mxu0 %v310_v32  ;;  %v495_v19 = vld [vmem:[#allocation12 + $0x8] sm:$0xff]  ;;  %v588_v32 = vld [vmem:[%s1312_s11] sm:$0x1] }
  0x6d   :  { %805 = vmatprep.subr.mxu1 %v1091_v1  ;;  %834 = vmatprep.subr.mxu0 %v1091_v1 }
  0x6e   :  { %806 = vmatpush3.msra.mxu1 %v212_v20  ;;  %835 = vmatpush3.msra.mxu0 %v309_v33  ;;  %v494_v20 = vld [vmem:[#allocation12] sm:$0xff]  ;;  %v595_v33 = vlaneseq }
  0x6f   :  { %845 = vmatprep.subr.mxu1 %v1091_v1  ;;  %836 = vmatprep.subr.mxu0 %v1091_v1 }
  0x70   :  { %837 = vmatpush3.msra.mxu0 %v308_v39  ;;  %932 = vset.pattern.permute.xlu0 %v1093_v27 }
  0x71   :  { %838 = vmatprep.subr.mxu0 %v1091_v1  ;;  %592 = vperm.xlu0 %932, %v589_v26  }
  0x72   :  { %839 = vmatpush3.msra.mxu0 %v307_v40 }
  0x73   :  { %840 = vmatprep.subr.mxu0 %v1091_v1 }
  0x74   :  { %841 = vmatpush3.msra.mxu0 %v306_v41 }
  0x75   :  { %880 = vmatprep.subr.mxu0 %v1091_v1 }
 0x113   :  { %v207_v35 = vpop.f32.mrf.mxu0 }
 0x114   :  { %v208_v36 = vadd.f32 %v689_v34, %v207_v35  ;;  %v596_v34 = vshrl.u32 %v595_v33, 7 }
 0x115   :  { %v774_v37 = vpop.f32.mrf.mxu0 }
 0x116   :  { %v211_v38 = vmax.f32 %v208_v36, 0.0  ;;  %v597_v35 = vsub.s32 0, %v596_v34  ;;  %v593_v36 = vpop.permute.xlu0 %592 }
 0x118   :  { %808 = vmatmul.mubr.f32.vlgmr.msra.gmra.mxu1 %v211_v38  ;;  %v598_v37 = vrot.slane %v593_v36, %v597_v35 }
 0x119   :  { %877 = vmatprep.mubr.msk.f32.mxu1 %vm1092_vm0, %v1091_v1  ;;  %846 = vmatpush3.msra.mxu1 %v415_v42 }
 0x11a   :  { %847 = vmatprep.subr.mxu1 %v1091_v1 }
 0x11b   :  { %848 = vmatpush3.msra.mxu1 %v414_v43 }
 0x11c   :  { %849 = vmatprep.subr.mxu1 %v1091_v1 }
 0x11d   :  { %850 = vmatpush3.msra.mxu1 %v413_v44 }
 0x11e   :  { %851 = vmatprep.subr.mxu1 %v1091_v1 }
 0x11f   :  { %852 = vmatpush3.msra.mxu1 %v412_v45 }
 0x120   :  { %853 = vmatprep.subr.mxu1 %v1091_v1 }
 0x121   :  { %854 = vmatpush3.msra.mxu1 %v411_v46 }
 0x122   :  { %855 = vmatprep.subr.mxu1 %v1091_v1 }
 0x123   :  { %856 = vmatpush3.msra.mxu1 %v410_v47 }
 0x124   :  { %857 = vmatprep.subr.mxu1 %v1091_v1 }
 0x125   :  { %858 = vmatpush3.msra.mxu1 %v409_v48 }
 0x126   :  { %859 = vmatprep.subr.mxu1 %v1091_v1 }
 0x127   :  { %860 = vmatpush3.msra.mxu1 %v408_v49 }
 0x128   :  { %861 = vmatprep.subr.mxu1 %v1091_v1 }
 0x129   :  { %862 = vmatpush3.msra.mxu1 %v407_v50 }
 0x12a   :  { %863 = vmatprep.subr.mxu1 %v1091_v1 }
 0x12b   :  { %864 = vmatpush3.msra.mxu1 %v406_v51 }
 0x12c   :  { %865 = vmatprep.subr.mxu1 %v1091_v1 }
 0x12d   :  { %866 = vmatpush3.msra.mxu1 %v405_v52 }
 0x12e   :  { %867 = vmatprep.subr.mxu1 %v1091_v1 }
 0x12f   :  { %868 = vmatpush3.msra.mxu1 %v404_v53 }
 0x130   :  { %869 = vmatprep.subr.mxu1 %v1091_v1 }
 0x131   :  { %870 = vmatpush3.msra.mxu1 %v403_v54 }
 0x132   :  { %871 = vmatprep.subr.mxu1 %v1091_v1 }
 0x133   :  { %872 = vmatpush3.msra.mxu1 %v402_v60 }
 0x134   :  { %873 = vmatprep.subr.mxu1 %v1091_v1 }
 0x135   :  { %874 = vmatpush3.msra.mxu1 %v401_v61 }
 0x136   :  { %875 = vmatprep.subr.mxu1 %v1091_v1 }
 0x137   :  { %876 = vmatpush3.msra.mxu1 %v400_v62 }
 0x138   :  { %915 = vmatprep.subr.mxu1 %v1091_v1 }
 0x1d8   :  { %v301_v56 = vpop.f32.mrf.mxu1 }
 0x1d9   :  { %v302_v57 = vadd.f32 %v691_v55, %v301_v56 }
 0x1da   :  { %v809_v58 = vpop.f32.mrf.mxu1 }
 0x1db   :  { %v305_v59 = vmax.f32 %v302_v57, 0.0 }
 0x1dd   :  { %843 = vmatmul.mubr.f32.vlgmr.msra.gmra.mxu0 %v305_v59 }
 0x1de   :  { %912 = vmatprep.mubr.msk.f32.mxu0 %vm1092_vm0, %v1091_v1  ;;  %881 = vmatpush3.msra.mxu0 %v509_v63 }
 0x1df   :  { %882 = vmatprep.subr.mxu0 %v1091_v1 }
 0x1e0   :  { %883 = vmatpush3.msra.mxu0 %v508_v0 }
 0x1e1   :  { %884 = vmatprep.subr.mxu0 %v1091_v1 }
 0x1e2   :  { %885 = vmatpush3.msra.mxu0 %v507_v2 }
 0x1e3   :  { %886 = vmatprep.subr.mxu0 %v1091_v1 }
 0x1e4   :  { %887 = vmatpush3.msra.mxu0 %v506_v3 }
 0x1e5   :  { %888 = vmatprep.subr.mxu0 %v1091_v1 }
 0x1e6   :  { %889 = vmatpush3.msra.mxu0 %v505_v4 }
 0x1e7   :  { %890 = vmatprep.subr.mxu0 %v1091_v1 }
 0x1e8   :  { %891 = vmatpush3.msra.mxu0 %v504_v5 }
 0x1e9   :  { %892 = vmatprep.subr.mxu0 %v1091_v1 }
 0x1ea   :  { %893 = vmatpush3.msra.mxu0 %v503_v6 }
 0x1eb   :  { %894 = vmatprep.subr.mxu0 %v1091_v1 }
 0x1ec   :  { %895 = vmatpush3.msra.mxu0 %v502_v7 }
 0x1ed   :  { %896 = vmatprep.subr.mxu0 %v1091_v1 }
 0x1ee   :  { %897 = vmatpush3.msra.mxu0 %v501_v8 }
 0x1ef   :  { %898 = vmatprep.subr.mxu0 %v1091_v1 }
 0x1f0   :  { %899 = vmatpush3.msra.mxu0 %v500_v9 }
 0x1f1   :  { %900 = vmatprep.subr.mxu0 %v1091_v1 }
 0x1f2   :  { %901 = vmatpush3.msra.mxu0 %v499_v10 }
 0x1f3   :  { %902 = vmatprep.subr.mxu0 %v1091_v1 }
 0x1f4   :  { %903 = vmatpush3.msra.mxu0 %v498_v11 }
 0x1f5   :  { %904 = vmatprep.subr.mxu0 %v1091_v1 }
 0x1f6   :  { %905 = vmatpush3.msra.mxu0 %v497_v12 }
 0x1f7   :  { %906 = vmatprep.subr.mxu0 %v1091_v1 }
 0x1f8   :  { %907 = vmatpush3.msra.mxu0 %v496_v18 }
 0x1f9   :  { %908 = vmatprep.subr.mxu0 %v1091_v1 }
 0x1fa   :  { %909 = vmatpush3.msra.mxu0 %v495_v19 }
 0x1fb   :  { %910 = vmatprep.subr.mxu0 %v1091_v1 }
 0x1fc   :  { %911 = vmatpush3.msra.mxu0 %v494_v20 }
 0x29d   :  { %v395_v14 = vpop.f32.mrf.mxu0 }
 0x29e   :  { %v396_v15 = vadd.f32 %v692_v13, %v395_v14 }
 0x29f   :  { %v844_v16 = vpop.f32.mrf.mxu0 }
 0x2a0   :  { %v399_v17 = vmax.f32 %v396_v15, 0.0 }
 0x2a2   :  { %878 = vmatmul.mubr.f32.vlgmr.msra.gmra.mxu1 %v399_v17 }
 0x2a3   :  { %917 = vmatprep.mubr.msk.f32.mxu1 %vm1092_vm0, %v1091_v1 }
 0x362   :  { %v489_v22 = vpop.f32.mrf.mxu1 }
 0x363   :  { %v490_v23 = vadd.f32 %v693_v21, %v489_v22 }
 0x364   :  { %v879_v24 = vpop.f32.mrf.mxu1 }
 0x365   :  { %v493_v25 = vmax.f32 %v490_v23, 0.0 }
 0x367   :  { %913 = vmatmul.mubr.f32.vlgmr.msra.gmra.mxu0 %v493_v25 }
 0x427   :  { %v583_v1 = vpop.f32.mrf.mxu0 }
 0x428   :  { %v584_v29 = vadd.f32 %v694_v28, %v583_v1 }
 0x429   :  { %v914_v30 = vpop.f32.mrf.mxu0 }
 0x42a   :  { %v587_v31 = vmax.f32 %v584_v29, 0.0 }
 0x42c   :  { %916 = vmatpush3.xpose.msra.mxu1 %v587_v31 }
 0x42f   :  { %918 = vmatmul.mubr.f32.vlgmr.msra.gmra.mxu1 %v588_v32 }
 0x4ef   :  { %v665_v38 = vpop.f32.mrf.mxu1 }
 0x4f0   :  { %v666_v39 = vadd.f32 %v665_v38, %v598_v37 }
 0x4f1   :  { %v919_v40 = vpop.f32.mrf.mxu1 }
 0x4f2   :  { %670 = vst.msk [vmem:[#allocation14] sm:$0x1] %vm669_vm2, %v666_v39 }
 0x4f3   :  { %1064 = shalt.err (!%p1061_p6)
}
 0x4f4   :  { %680 = dma.vmem_to_hbm [thread:$0]  %s678_s25, 16, %s1314_s13, [#allocation5]  }
 0x4f5   :  { %1081 = dma.done.wait [#allocation5], 16  }
 0x4f6   :  { %1082 = vsyncadd [#allocation5], 4294967280 }
 0x4f7   :  { %684 = vsyncpa [#allocation4], 1 }
 0x4f8   :  { %685 = vsyncpa [#allocation7], 1 }
 0x4f9   :  { %686 = vsyncpa [#allocation10], 1 }
 0x4fa   :  { %687 = vsyncpa [#allocation13], 1 }
 0x4fb   :  { %688 = vsyncpa [#allocation5], 1 }

</bundles_post_ra>
